<compile_context>
chip_gen: v7x
topology: tpu7x:2x2x1
jax: 0.10.0
libtpu: 0.0.40
codegen_flags: <defaults>
</compile_context>

<pallas_src>
import functools

import jax
import jax.numpy as jnp
from jax.experimental import pallas as pl
from jax.experimental.pallas import tpu as pltpu

PDIST_EPS = 1e-6  # torch.nn.PairwiseDistance default eps


def _round_up(x, m):
    return ((x + m - 1) // m) * m


def _cdiv(a, b):
    return -(-a // b)


def _is_v7x():
    """Best-effort chip-generation probe (default: not v7x => single TensorCore)."""
    kind = ""
    try:
        dev = jax.devices()[0]
        kind = str(getattr(dev, "device_kind", "") or "").lower()
    except Exception:
        pass
    return ("v7" in kind) or ("tpu7" in kind) or ("ironwood" in kind)


def _contrastive_loss_kernel(margin_ref, o1_ref, o2_ref, lbl_ref, out_ref, acc_ref,
                             *, true_b, tile_b, tiles_per_split):
    s = pl.program_id(0)   # split index ("parallel": one per TensorCore on v7x)
    i = pl.program_id(1)   # batch tile within split ("arbitrary" reduction axis)

    @pl.when(i == 0)
    def _init():
        acc_ref[0] = jnp.float32(0.0)

    margin = margin_ref[0]

    o1 = o1_ref[...].astype(jnp.float32)      # (tile_b, D)
    o2 = o2_ref[...].astype(jnp.float32)      # (tile_b, D)
    lbl = lbl_ref[...].astype(jnp.float32)    # (tile_b, 1)

    # PairwiseDistance(2): ||x1 - x2 + eps||_2 along the feature dim.
    diff = o1 - o2 + jnp.float32(PDIST_EPS)
    d2 = jnp.sum(diff * diff, axis=-1, keepdims=True)    # (tile_b, 1)
    d = jnp.sqrt(d2)                                      # single EUP sqrt (hinge only)

    hinge = jnp.maximum(margin - d, 0.0)
    per_sample = lbl * d2 + (1.0 - lbl) * (hinge * hinge)  # (tile_b, 1)

    # Zero rows past the true batch (remainder-block garbage rows and dead tiles).
    # The select replaces any NaN/Inf garbage before it can reach the reduction.
    row0 = (s * tiles_per_split + i) * tile_b
    local = jax.lax.broadcasted_iota(jnp.int32, (tile_b, 1), 0)
    per_sample = jnp.where(row0 + local < true_b, per_sample, 0.0)

    # Accumulate this tile's sum in a scalar SMEM scratch (no per-step VMEM RMW).
    acc_ref[0] = acc_ref[0] + jnp.sum(per_sample)

    @pl.when(i == tiles_per_split - 1)
    def _finalize():
        out_ref[...] = jnp.full((8, 128), acc_ref[0], dtype=jnp.float32)


def contrastive_loss(output1, output2, label, margin=1.0, *,
                     block_rows=None, splits=None):
    """mean(label * d^2 + (1 - label) * max(margin - d, 0)^2), d = ||o1 - o2 + eps||_2."""
    B, D = output1.shape
    itemsize = jnp.dtype(output1.dtype).itemsize
    is_v7 = _is_v7x()

    # Per-row VMEM bytes: 2 inputs x 2 pipeline buffers (input dtype), ~3 f32 temps
    # from the in-kernel casts (casted inputs / diff / square), and the lane-padded
    # (tile_b, 1) f32 label block x 2 buffers (128 lanes x 4 B each).
    per_row_bytes = 4 * D * itemsize + 3 * D * 4 + 2 * 128 * 4

    data_budget = (32 << 20) if is_v7 else (64 << 20)   # v7x VMEM = 64 MiB, else 128 MiB
    vmem_cap = (48 << 20) if is_v7 else (80 << 20)

    rows_fit = max(8, (data_budget // per_row_bytes) // 8 * 8)
    tile_b = min(rows_fit, _round_up(B, 8))
    if block_rows is not None:
        tile_b = min(tile_b, max(8, (int(block_rows) // 8) * 8))

    total_tiles = _cdiv(B, tile_b)
    if splits is not None:
        num_splits = max(1, int(splits))
    else:
        # 2-way split only on v7x (2 TCs); v5e/v6e are single-TensorCore.
        num_splits = 2 if (is_v7 and total_tiles >= 2) else 1
    tiles_per_split = _cdiv(total_tiles, num_splits)
    last_block = total_tiles - 1

    lbl2d = label.reshape(B, 1).astype(jnp.float32)
    margin_arr = jnp.asarray([margin], dtype=jnp.float32)

    kernel = functools.partial(
        _contrastive_loss_kernel,
        true_b=B, tile_b=tile_b, tiles_per_split=tiles_per_split)

    # Clamp keeps every DMA in bounds; a clamped ("dead") tile is fully masked in-kernel.
    def row_map(s, i, _margin):
        return (jnp.minimum(s * tiles_per_split + i, last_block), 0)

    vmem_limit = int(min(vmem_cap,
                         max(32 << 20, tile_b * per_row_bytes + (8 << 20))))

    out = pl.pallas_call(
        kernel,
        out_shape=jax.ShapeDtypeStruct((num_splits * 8, 128), jnp.float32),
        grid_spec=pltpu.PrefetchScalarGridSpec(
            num_scalar_prefetch=1,
            grid=(num_splits, tiles_per_split),
            in_specs=[
                pl.BlockSpec((tile_b, D), row_map),
                pl.BlockSpec((tile_b, D), row_map),
                pl.BlockSpec((tile_b, 1), row_map),
            ],
            out_specs=pl.BlockSpec((8, 128), lambda s, i, _m: (s, 0)),
            scratch_shapes=[pltpu.SMEM((1,), jnp.float32)],
        ),
        compiler_params=pltpu.CompilerParams(
            dimension_semantics=("parallel", "arbitrary"),
            vmem_limit_bytes=vmem_limit,
        ),
        cost_estimate=pl.CostEstimate(
            flops=int(5 * B * D + 8 * B),
            transcendentals=int(B),
            bytes_accessed=int(2 * B * D * itemsize + 4 * B + 4
                               + num_splits * 8 * 128 * 4),
        ),
    )(margin_arr, output1, output2, lbl2d)

    # Each split's partial sum is replicated over its (8, 128) block.
    partials = out[0::8, 0]                           # (num_splits,)
    return jnp.sum(partials) / jnp.float32(B)


def _reference_loss(output1, output2, label, margin=1.0):
    x1 = output1.astype(jnp.float32)
    x2 = output2.astype(jnp.float32)
    diff = x1 - x2 + PDIST_EPS
    d = jnp.sqrt(jnp.sum(diff * diff, axis=-1))
    lbl = label.astype(jnp.float32)
    hinge = jnp.maximum(margin - d, 0.0)
    return jnp.mean(lbl * d * d + (1.0 - lbl) * hinge * hinge)


if __name__ == "__main__":
    key = jax.random.PRNGKey(0)
    k1, k2, k3, k4, k5, k6 = jax.random.split(key, 6)

    # Primary small test (batch=8, hidden=32), matching the module's forward.
    B, D = 8, 32
    o1 = jax.random.normal(k1, (B, D), dtype=jnp.float32)
    o2 = jax.random.normal(k2, (B, D), dtype=jnp.float32)
    lbl = jax.random.bernoulli(k3, p=0.5, shape=(B,)).astype(jnp.float32)

    loss = contrastive_loss(o1, o2, lbl, margin=1.0)
    jax.block_until_ready(loss)
    ref = _reference_loss(o1, o2, lbl, margin=1.0)
    assert jnp.allclose(loss, ref, rtol=1e-5, atol=1e-5), (loss, ref)

    # Secondary test: ragged batch (B not a multiple of the tile or of 8), bf16 inputs,
    # forced small tiles + forced 2-way split so the multi-tile reduction, the
    # remainder-row mask and the dead-tile clamp are all exercised on any chip.
    B2, D2 = 519, 128
    o1b = jax.random.normal(k4, (B2, D2), dtype=jnp.bfloat16)
    o2b = jax.random.normal(k5, (B2, D2), dtype=jnp.bfloat16)
    lblb = jax.random.bernoulli(k6, p=0.5, shape=(B2,)).astype(jnp.float32)

    loss2 = contrastive_loss(o1b, o2b, lblb, margin=1.0, block_rows=128, splits=2)
    jax.block_until_ready(loss2)
    ref2 = _reference_loss(o1b, o2b, lblb, margin=1.0)
    assert jnp.allclose(loss2, ref2, rtol=2e-3, atol=2e-3), (loss2, ref2)

    # Third test: fully automatic configuration (generation-dependent split / tile size).
    loss3 = contrastive_loss(o1b, o2b, lblb, margin=0.5)
    jax.block_until_ready(loss3)
    ref3 = _reference_loss(o1b, o2b, lblb, margin=0.5)
    assert jnp.allclose(loss3, ref3, rtol=2e-3, atol=2e-3), (loss3, ref3)

    print("KERNEL_OK")
</pallas_src>

<mosaic_0001>
module attributes {stable_mosaic.version = 11 : i64} {
  func.func @_contrastive_loss_kernel(%arg0: i32, %arg1: i32, %arg2: memref<1xf32, #tpu.memory_space<smem>>, %arg3: memref<8x32xf32, #tpu.memory_space<vmem>>, %arg4: memref<8x32xf32, #tpu.memory_space<vmem>>, %arg5: memref<8x1xf32, #tpu.memory_space<vmem>>, %arg6: memref<8x128xf32, #tpu.memory_space<vmem>>, %arg7: memref<1xf32, #tpu.memory_space<smem>>) attributes {dimension_semantics = [#tpu.dimension_semantics<parallel>, #tpu.dimension_semantics<arbitrary>], iteration_bounds = array<i64: 1, 1>, scalar_prefetch = 1 : i64, scratch_operands = 1 : i64, tpu.core_type = #tpu.core_type<tc>, window_params = [{transform_indices = @transform_0, window_bounds = array<i64: 8, 32>}, {transform_indices = @transform_1, window_bounds = array<i64: 8, 32>}, {transform_indices = @transform_2, window_bounds = array<i64: 8, 1>}, {transform_indices = @transform_3, window_bounds = array<i64: 8, 128>}]} {
    %c0_i32 = arith.constant 0 : i32
    %0 = arith.cmpi eq, %arg1, %c0_i32 : i32
    %1 = arith.extui %0 : i1 to i32
    %c0_i32_0 = arith.constant 0 : i32
    %2 = arith.cmpi ne, %1, %c0_i32_0 : i32
    scf.if %2 {
      %cst_17 = arith.constant 0.000000e+00 : f32
      %c0_18 = arith.constant 0 : index
      %44 = memref.load %arg7[%c0_18] : memref<1xf32, #tpu.memory_space<smem>>
      memref.store %cst_17, %arg7[%c0_18] : memref<1xf32, #tpu.memory_space<smem>>
    } else {
    }
    %c0 = arith.constant 0 : index
    %3 = memref.load %arg2[%c0] : memref<1xf32, #tpu.memory_space<smem>>
    %c0_1 = arith.constant 0 : index
    %c0_2 = arith.constant 0 : index
    %4 = vector.load %arg3[%c0_1, %c0_2] : memref<8x32xf32, #tpu.memory_space<vmem>>, vector<8x32xf32>
    %c0_3 = arith.constant 0 : index
    %c0_4 = arith.constant 0 : index
    %5 = vector.load %arg4[%c0_3, %c0_4] : memref<8x32xf32, #tpu.memory_space<vmem>>, vector<8x32xf32>
    %c0_5 = arith.constant 0 : index
    %c0_6 = arith.constant 0 : index
    %6 = vector.load %arg5[%c0_5, %c0_6] : memref<8x1xf32, #tpu.memory_space<vmem>>, vector<8x1xf32>
    %7 = arith.subf %4, %5 : vector<8x32xf32>
    %cst = arith.constant 9.99999997E-7 : f32
    %8 = vector.broadcast %cst : f32 to vector<8x32xf32>
    %9 = arith.addf %7, %8 : vector<8x32xf32>
    %10 = arith.mulf %9, %9 : vector<8x32xf32>
    %cst_7 = arith.constant dense<0.000000e+00> : vector<8xf32>
    %11 = vector.multi_reduction <add>, %10, %cst_7 [1] : vector<8x32xf32> to vector<8xf32>
    %12 = vector.shape_cast %11 : vector<8xf32> to vector<8x1xf32>
    %13 = math.sqrt %12 : vector<8x1xf32>
    %14 = vector.broadcast %3 : f32 to vector<8x1xf32>
    %15 = arith.subf %14, %13 : vector<8x1xf32>
    %cst_8 = arith.constant 0.000000e+00 : f32
    %16 = vector.broadcast %cst_8 : f32 to vector<8x1xf32>
    %17 = arith.maximumf %15, %16 : vector<8x1xf32>
    %18 = arith.mulf %6, %12 : vector<8x1xf32>
    %cst_9 = arith.constant 1.000000e+00 : f32
    %19 = vector.broadcast %cst_9 : f32 to vector<8x1xf32>
    %20 = arith.subf %19, %6 : vector<8x1xf32>
    %21 = arith.mulf %17, %17 : vector<8x1xf32>
    %22 = arith.mulf %20, %21 : vector<8x1xf32>
    %23 = arith.addf %18, %22 : vector<8x1xf32>
    %c1_i32 = arith.constant 1 : i32
    %24 = arith.muli %arg0, %c1_i32 : i32
    %25 = arith.addi %24, %arg1 : i32
    %c8_i32 = arith.constant 8 : i32
    %26 = arith.muli %25, %c8_i32 : i32
    %27 = tpu.iota {dimensions = array<i32: 0>} : vector<8x1xi32>
    %28 = vector.broadcast %26 : i32 to vector<8x1xi32>
    %29 = arith.addi %28, %27 : vector<8x1xi32>
    %c8_i32_10 = arith.constant 8 : i32
    %30 = vector.broadcast %c8_i32_10 : i32 to vector<8x1xi32>
    %31 = arith.cmpi slt, %29, %30 : vector<8x1xi32>
    %cst_11 = arith.constant 0.000000e+00 : f32
    %32 = vector.broadcast %cst_11 : f32 to vector<8x1xf32>
    %33 = arith.select %31, %23, %32 : vector<8x1xi1>, vector<8x1xf32>
    %c0_12 = arith.constant 0 : index
    %34 = memref.load %arg7[%c0_12] : memref<1xf32, #tpu.memory_space<smem>>
    %35 = vector.shape_cast %33 : vector<8x1xf32> to vector<1x8x1xf32>
    %cst_13 = arith.constant dense<0.000000e+00> : vector<1xf32>
    %36 = vector.multi_reduction <add>, %35, %cst_13 [1, 2] : vector<1x8x1xf32> to vector<1xf32>
    %37 = vector.shape_cast %36 : vector<1xf32> to vector<1x1x1xf32>
    %38 = vector.extract %37[0, 0, 0] : f32 from vector<1x1x1xf32>
    %39 = arith.addf %34, %38 : f32
    %c0_14 = arith.constant 0 : index
    %40 = memref.load %arg7[%c0_14] : memref<1xf32, #tpu.memory_space<smem>>
    memref.store %39, %arg7[%c0_14] : memref<1xf32, #tpu.memory_space<smem>>
    %c0_i32_15 = arith.constant 0 : i32
    %41 = arith.cmpi eq, %arg1, %c0_i32_15 : i32
    %42 = arith.extui %41 : i1 to i32
    %c0_i32_16 = arith.constant 0 : i32
    %43 = arith.cmpi ne, %42, %c0_i32_16 : i32
    scf.if %43 {
      %c0_17 = arith.constant 0 : index
      %44 = memref.load %arg7[%c0_17] : memref<1xf32, #tpu.memory_space<smem>>
      %45 = vector.broadcast %44 : f32 to vector<8x128xf32>
      %c0_18 = arith.constant 0 : index
      %c0_19 = arith.constant 0 : index
      %46 = vector.load %arg6[%c0_18, %c0_19] : memref<8x128xf32, #tpu.memory_space<vmem>>, vector<8x128xf32>
      tpu.vector_store %arg6[%c0_18, %c0_19], %45 {strides = array<i32>} : memref<8x128xf32, #tpu.memory_space<vmem>>, vector<8x128xf32>,
    } else {
    }
    return
  }
  func.func @transform_0(%arg0: i32, %arg1: i32, %arg2: memref<1xf32, #tpu.memory_space<smem>>) -> (i32, i32) {
    %c1_i32 = arith.constant 1 : i32
    %0 = arith.muli %arg0, %c1_i32 : i32
    %1 = arith.addi %0, %arg1 : i32
    %c0_i32 = arith.constant 0 : i32
    %2 = arith.minsi %1, %c0_i32 : i32
    %c0_i32_0 = arith.constant 0 : i32
    %c0_i32_1 = arith.constant 0 : i32
    return %2, %c0_i32_0 : i32, i32
  }
  func.func @transform_1(%arg0: i32, %arg1: i32, %arg2: memref<1xf32, #tpu.memory_space<smem>>) -> (i32, i32) {
    %c1_i32 = arith.constant 1 : i32
    %0 = arith.muli %arg0, %c1_i32 : i32
    %1 = arith.addi %0, %arg1 : i32
    %c0_i32 = arith.constant 0 : i32
    %2 = arith.minsi %1, %c0_i32 : i32
    %c0_i32_0 = arith.constant 0 : i32
    %c0_i32_1 = arith.constant 0 : i32
    return %2, %c0_i32_0 : i32, i32
  }
  func.func @transform_2(%arg0: i32, %arg1: i32, %arg2: memref<1xf32, #tpu.memory_space<smem>>) -> (i32, i32) {
    %c1_i32 = arith.constant 1 : i32
    %0 = arith.muli %arg0, %c1_i32 : i32
    %1 = arith.addi %0, %arg1 : i32
    %c0_i32 = arith.constant 0 : i32
    %2 = arith.minsi %1, %c0_i32 : i32
    %c0_i32_0 = arith.constant 0 : i32
    %c0_i32_1 = arith.constant 0 : i32
    return %2, %c0_i32_0 : i32, i32
  }
  func.func @transform_3(%arg0: i32, %arg1: i32, %arg2: memref<1xf32, #tpu.memory_space<smem>>) -> (i32, i32) {
    %c0_i32 = arith.constant 0 : i32
    %c0_i32_0 = arith.constant 0 : i32
    return %arg0, %c0_i32 : i32, i32
  }
}

</mosaic_0001>

<bundles_post_ra>
// kernel: tpu_custom_call.1
= control target key start
LH: loop header
LB: loop body
LE: loop exit
PB: predicated region body
PF: predicated region fallthrough
CT: control target
= control target key end

     0   :  { %s270_s0 = inlined_call_operand.<no memory space> [shape: f32[1], index: 0, kind: input, shape index: {}]   ;;  %s271_s1 = inlined_call_operand.vmem [shape: f32[8,32], index: 1, kind: input, shape index: {}]   ;;  %s272_s2 = inlined_call_operand.vmem [shape: f32[8,32], index: 2, kind: input, shape index: {}]   ;;  %s273_s3 = inlined_call_operand.vmem [shape: f32[8,1], index: 3, kind: input, shape index: {}]   ;;  %s274_s4 = inlined_call_operand.hbm [shape: f32[8,128], index: 4, kind: output, shape index: {}]  }
   0x1   :  { %v105_v0 = vld [vmem:[%s271_s1] sm:$0xff] }
   0x2   :  { %v106_v1 = vld [vmem:[%s272_s2] sm:$0xff] }
   0x3   :  { %10 = vsyncpa [#allocation6], 0  ;;  %v108_v2 = vsub.f32 %v105_v0, %v106_v1  ;;  %vm111_vm0 = vcmask 261120   ;;  %v122_v10 = vstv %s270_s0  ;;  %v107_v14 = vld [vmem:[%s273_s3] sm:$0xff]  ;;  %vm139_vm3 = vcmask 7168   ;;  %s220_s0 = smov [#allocation5]  }
   0x4   :  { %v126_v16 = vsub.f32 1.0, %v107_v14  ;;  %s165_s21 = sshll.u32 %s220_s0, 4  ;;  %s166_s21 = int_to_ptr.vmem [resolvable:$true] %s165_s21 }
   0x5   :  { %v109_v3 = vadd.f32 1e-06, %v108_v2  ;;  %s196_s22 = scalar_lea.vmem %s166_s21, 128  ;;  %p201_p1 = scmp.lt.s32.totalorder %s166_s21, %s166_s21 }
   0x6   :  { %p197_p0 = scmp.ne.s32.totalorder %s166_s21, %s196_s22  ;;  %p202_p2 = scmp.lt.s32.totalorder %s196_s22, %s196_s22 }
   0x7   :  { %v110_v4 = vmul.f32 %v109_v3, %v109_v3 }
   0x8   :  { %p203_p3 = por %p202_p2, %p201_p1 }
   0x9   :  { %v112_v5 = vsel %vm111_vm0, %v110_v4, 0.0 }
   0xa   :  { %113 = vadd.xlane.f32.xlu0 %v112_v5  ;;  %p204_p4 = pnand %p203_p3, %p197_p0 }
  0x97   :  { %v114_v6 = vpop.xlane.xlu0 %113 }
  0x98   :  { %194 = vrsqrt.f32 %v114_v6  ;;  %vm117_vm1 = vcmp.eq.f32.partialorder %v114_v6, inf  ;;  %v120_v9 = vand.u32 2147483648, %v114_v6  ;;  %vm119_vm2 = vcmp.eq.f32.partialorder %v114_v6, 0.0 }
  0x99   :  { %v125_v18 = vmul.f32 %v114_v6, %v107_v14 }
  0xa2   :  { %v195_v7 = vpop.eup %194 }
  0xa3   :  { %v116_v8 = vmul.f32 %v195_v7, %v114_v6 }
  0xa5   :  { %v118_v11 = vsel %vm117_vm1, %v114_v6, %v116_v8 }
  0xa6   :  { %v121_v12 = vsel %vm119_vm2, %v120_v9, %v118_v11 }
  0xa7   :  { %v123_v13 = vsub.f32 %v122_v10, %v121_v12 }
  0xa9   :  { %v124_v15 = vmax.f32 %v123_v13, 0.0 }
  0xab   :  { %v127_v17 = vmul.f32 %v124_v15, %v124_v15 }
  0xad   :  { %v128_v19 = vmul.f32 %v127_v17, %v126_v16 }
  0xaf   :  { %v129_v20 = vadd.f32 %v128_v19, %v125_v18 }
  0xb1   :  { %v140_v21 = vsel %vm139_vm3, %v129_v20, 0.0 }
  0xb2   :  { %141 = vadd.xlane.f32.xlu0 %v140_v21 }
 0x13f   :  { %v142_v22 = vpop.xlane.xlu0 %141 }
 0x140   :  { %v143_v23 = vrot.slane %v142_v22, 4 }
 0x142   :  { %v144_v24 = vadd.f32 %v143_v23, %v142_v22 }
 0x144   :  { %v145_v25 = vrot.slane %v144_v24, 2 }
 0x146   :  { %v146_v26 = vadd.f32 %v145_v25, %v144_v24 }
 0x148   :  { %v147_v27 = vrot.slane %v146_v26, 1 }
 0x14a   :  { %v148_v28 = vadd.f32 %v147_v27, %v146_v26 }
 0x14c   :  { %191 = vpush %v148_v28 }
 0x17d   :  { %s192_s3 = spop %191 }
 0x17e   :  { %v157_v29 = vstv %s192_s3 }
 0x17f   :  { %158 = vst [vmem:[#allocation5] sm:$0xff] %v157_v29 }
 0x180   :  { %207 = shalt.err (!%p204_p4)
}
 0x181   :  { %s208_s25 = scalar_lea.hbm %s274_s4, 128 }
 0x182   :  { %p209_p5 = scmp.ne.s32.totalorder %s274_s4, %s208_s25  ;;  %p212_p6 = scmp.lt.u32.totalorder %s208_s25, %s274_s4 }
 0x184   :  { %p214_p7 = pnand %p212_p6, %p209_p5 }
 0x186   :  { %217 = shalt.err (!%p214_p7)
}
 0x187   :  { %168 = dma.vmem_to_hbm [thread:$0]  %s166_s21, 128, %s274_s4, [#allocation6]  }
 0x188   :  { %218 = dma.done.wait [#allocation6], 128  }
 0x189   :  { %219 = vsyncadd [#allocation6], 4294967168 }
 0x18a   :  { %172 = vsyncpa [#allocation6], 1 }

</bundles_post_ra>
